<compile_context>
chip_gen: v7x
topology: tpu7x:2x2x1
jax: 0.10.0
libtpu: 0.0.40
codegen_flags: <defaults>
</compile_context>

<pallas_src>
import functools

import jax
import jax.numpy as jnp
from jax.experimental import pallas as pl
from jax.experimental.pallas import tpu as pltpu

_LANE = 128


def _round_up(x, m):
    return ((x + m - 1) // m) * m


def dualmlp_kernel(lvec_ref, rvec_ref, w1m_ref, w1a_ref, b1_ref,
                   w2_ref, b2_ref, out_ref, *, compute_dtype):
    # Elementwise distance features in f32 on the VPU (v5e has no bf16 VPU);
    # inputs may arrive as bf16 to save HBM bandwidth and are upcast here.
    l = lvec_ref[...].astype(jnp.float32)
    r = rvec_ref[...].astype(jnp.float32)
    mult_dist = l * r
    abs_dist = jnp.abs(l - r)

    # Exact f32 path must not silently use a bf16 multi-pass MXU decomposition.
    precision = (jax.lax.Precision.HIGHEST
                 if compute_dtype == jnp.float32 else None)

    # layer_1: cat((mult, abs), 1) @ W1 + b1, split to avoid the concat (MXU),
    # bf16/f32 operands with f32 accumulation.
    h = (jnp.dot(mult_dist.astype(compute_dtype), w1m_ref[...],
                 preferred_element_type=jnp.float32, precision=precision)
         + jnp.dot(abs_dist.astype(compute_dtype), w1a_ref[...],
                   preferred_element_type=jnp.float32, precision=precision)
         + b1_ref[...])

    # ReLU
    h = jnp.maximum(h, 0.0)

    # layer_2 on lane-padded weights (MXU-friendly), then store only the real
    # output lanes -> compact (B, output_dim) array in HBM, no wrapper slice.
    out = (jnp.dot(h.astype(compute_dtype), w2_ref[...],
                   preferred_element_type=jnp.float32, precision=precision)
           + b2_ref[...])
    out_ref[...] = out[:, :out_ref.shape[1]].astype(out_ref.dtype)


def prepare_dualmlp_params(w1, b1, w2, b2, rep_dim, compute_dtype=jnp.bfloat16):
    """One-time (per model) weight preparation: split, pad to lane-aligned sizes,
    cast matmul operands to `compute_dtype` (biases stay f32 for the f32 epilogue).

    w1 : (2*rep_dim, hidden)   pre-transposed PyTorch layer_1 weight
    b1 : (hidden,)
    w2 : (hidden, output_dim)  pre-transposed PyTorch layer_2 weight
    b2 : (output_dim,)
    """
    hidden = w1.shape[1]
    output_dim = w2.shape[1]
    h_pad = _round_up(hidden, _LANE)
    o_pad = _round_up(output_dim, _LANE)

    # Zero-padding is exact: padded hidden columns of W1 give relu(0+0)=0, and
    # padded hidden rows / output cols of W2 contribute nothing (and the padded
    # output lanes are never written to HBM anyway).
    w1m = jnp.zeros((rep_dim, h_pad), compute_dtype)
    w1m = w1m.at[:, :hidden].set(w1[:rep_dim, :].astype(compute_dtype))
    w1a = jnp.zeros((rep_dim, h_pad), compute_dtype)
    w1a = w1a.at[:, :hidden].set(w1[rep_dim:, :].astype(compute_dtype))
    b1p = jnp.zeros((1, h_pad), jnp.float32)
    b1p = b1p.at[:, :hidden].set(b1.astype(jnp.float32)[None, :])

    w2p = jnp.zeros((h_pad, o_pad), compute_dtype)
    w2p = w2p.at[:hidden, :output_dim].set(w2.astype(compute_dtype))
    b2p = jnp.zeros((1, o_pad), jnp.float32)
    b2p = b2p.at[:, :output_dim].set(b2.astype(jnp.float32)[None, :])

    return {
        "w1m": w1m, "w1a": w1a, "b1": b1p, "w2": w2p, "b2": b2p,
        "rep_dim": rep_dim, "hidden": hidden, "output_dim": output_dim,
        "h_pad": h_pad, "o_pad": o_pad, "compute_dtype": compute_dtype,
    }


def _choose_batch_tile(B, tb):
    """Pick a batch tile: big (amortize per-step overhead), multiple of 8, and
    guaranteeing >=2 grid steps when B is large enough so v7x megacore splits work."""
    tb = min(tb, B)
    if B > 8:
        tb = min(tb, _round_up(pl.cdiv(B, 2), 8))
        tb = max(8, (tb // 8) * 8)
    return max(tb, 1)


def dual_mlp(lvec, rvec, params, *, tb=8192):
    """Pallas DualMLP forward.

    lvec, rvec : (B, rep_dim) float32 or bfloat16
    params     : output of prepare_dualmlp_params()
    returns (B, output_dim) float32
    """
    B, rep_dim = lvec.shape
    assert rep_dim == params["rep_dim"]
    h_pad = params["h_pad"]
    o_pad = params["o_pad"]
    output_dim = params["output_dim"]

    tb = _choose_batch_tile(B, tb)
    grid = (pl.cdiv(B, tb),)
    # A partial final block is fine: rows are independent, out_ref is overwritten
    # (never accumulated), and the pipeline masks edge-block writeback.

    kernel = functools.partial(dualmlp_kernel,
                               compute_dtype=params["compute_dtype"])

    out = pl.pallas_call(
        kernel,
        out_shape=jax.ShapeDtypeStruct((B, output_dim), jnp.float32),
        grid=grid,
        in_specs=[
            pl.BlockSpec((tb, rep_dim), lambda i: (i, 0)),      # lvec (tiled)
            pl.BlockSpec((tb, rep_dim), lambda i: (i, 0)),      # rvec (tiled)
            pl.BlockSpec((rep_dim, h_pad), lambda i: (0, 0)),   # w1m (resident)
            pl.BlockSpec((rep_dim, h_pad), lambda i: (0, 0)),   # w1a (resident)
            pl.BlockSpec((1, h_pad), lambda i: (0, 0)),         # b1  (resident)
            pl.BlockSpec((h_pad, o_pad), lambda i: (0, 0)),     # w2  (resident)
            pl.BlockSpec((1, o_pad), lambda i: (0, 0)),         # b2  (resident)
        ],
        # last dim == full array dim -> legal BlockSpec, compact HBM output
        out_specs=pl.BlockSpec((tb, output_dim), lambda i: (i, 0)),
        compiler_params=pltpu.CompilerParams(
            dimension_semantics=("parallel",)),                 # megacore on v7x
    )(lvec, rvec, params["w1m"], params["w1a"], params["b1"],
      params["w2"], params["b2"])

    return out


def dual_mlp_ref(lvec, rvec, w1, b1, w2, b2):
    """Pure-JAX f32 reference matching the PyTorch forward."""
    lvec = lvec.astype(jnp.float32)
    rvec = rvec.astype(jnp.float32)
    mult_dist = lvec * rvec
    abs_dist = jnp.abs(lvec - rvec)
    vec_dist = jnp.concatenate((mult_dist, abs_dist), axis=1)
    h = jnp.maximum(vec_dist @ w1 + b1, 0.0)
    return h @ w2 + b2


if __name__ == "__main__":
    # small shapes consistent with the module
    B = 8
    rep_dim = 32
    hidden_dim = 64
    output_dim = 16

    key = jax.random.PRNGKey(0)
    k_l, k_r, k_w1, k_b1, k_w2, k_b2, k_l2, k_r2 = jax.random.split(key, 8)

    lvec = jax.random.normal(k_l, (B, rep_dim), dtype=jnp.float32)
    rvec = jax.random.normal(k_r, (B, rep_dim), dtype=jnp.float32)

    # deterministic parameter init (uniform, PyTorch-Linear-style bounds),
    # stored pre-transposed as (in_features, out_features)
    bound1 = 1.0 / (2 * rep_dim) ** 0.5
    w1 = jax.random.uniform(k_w1, (2 * rep_dim, hidden_dim),
                            minval=-bound1, maxval=bound1, dtype=jnp.float32)
    b1 = jax.random.uniform(k_b1, (hidden_dim,),
                            minval=-bound1, maxval=bound1, dtype=jnp.float32)
    bound2 = 1.0 / hidden_dim ** 0.5
    w2 = jax.random.uniform(k_w2, (hidden_dim, output_dim),
                            minval=-bound2, maxval=bound2, dtype=jnp.float32)
    b2 = jax.random.uniform(k_b2, (output_dim,),
                            minval=-bound2, maxval=bound2, dtype=jnp.float32)

    ref = dual_mlp_ref(lvec, rvec, w1, b1, w2, b2)

    # exact-semantics path: f32 MXU operands (precision=HIGHEST), tight tolerance
    params_f32 = prepare_dualmlp_params(w1, b1, w2, b2, rep_dim,
                                        compute_dtype=jnp.float32)
    out_f32 = jax.block_until_ready(dual_mlp(lvec, rvec, params_f32))
    assert out_f32.shape == (B, output_dim)
    assert jnp.allclose(out_f32, ref, atol=1e-5, rtol=1e-5)

    # fast path for v6e/v7x: bf16 MXU operands with f32 accumulation
    params_bf16 = prepare_dualmlp_params(w1, b1, w2, b2, rep_dim,
                                         compute_dtype=jnp.bfloat16)
    out_bf16 = jax.block_until_ready(dual_mlp(lvec, rvec, params_bf16))
    assert out_bf16.shape == (B, output_dim)
    assert jnp.allclose(out_bf16, ref, atol=5e-2, rtol=5e-2)

    # multi-step grid + partial last block + bf16 inputs (halved input HBM traffic)
    B2 = 200
    lvec2 = jax.random.normal(k_l2, (B2, rep_dim), dtype=jnp.float32)
    rvec2 = jax.random.normal(k_r2, (B2, rep_dim), dtype=jnp.float32)
    ref2 = dual_mlp_ref(lvec2, rvec2, w1, b1, w2, b2)
    out2 = jax.block_until_ready(
        dual_mlp(lvec2.astype(jnp.bfloat16), rvec2.astype(jnp.bfloat16),
                 params_bf16, tb=64))
    assert out2.shape == (B2, output_dim)
    assert jnp.allclose(out2, ref2, atol=8e-2, rtol=8e-2)

    print("KERNEL_OK")
</pallas_src>

<mosaic_0001>
module attributes {stable_mosaic.version = 11 : i64} {
  func.func @dualmlp_kernel(%arg0: i32, %arg1: memref<8x32xf32, #tpu.memory_space<vmem>>, %arg2: memref<8x32xf32, #tpu.memory_space<vmem>>, %arg3: memref<32x128xf32, #tpu.memory_space<vmem>>, %arg4: memref<32x128xf32, #tpu.memory_space<vmem>>, %arg5: memref<1x128xf32, #tpu.memory_space<vmem>>, %arg6: memref<128x128xf32, #tpu.memory_space<vmem>>, %arg7: memref<1x128xf32, #tpu.memory_space<vmem>>, %arg8: memref<8x16xf32, #tpu.memory_space<vmem>>) attributes {dimension_semantics = [#tpu.dimension_semantics<parallel>], iteration_bounds = array<i64: 1>, scalar_prefetch = 0 : i64, scratch_operands = 0 : i64, tpu.core_type = #tpu.core_type<tc>, window_params = [{transform_indices = @transform_0, window_bounds = array<i64: 8, 32>}, {transform_indices = @transform_1, window_bounds = array<i64: 8, 32>}, {pipeline_mode = #tpu.pipeline_mode<synchronous>, transform_indices = @transform_2, window_bounds = array<i64: 32, 128>}, {pipeline_mode = #tpu.pipeline_mode<synchronous>, transform_indices = @transform_3, window_bounds = array<i64: 32, 128>}, {pipeline_mode = #tpu.pipeline_mode<synchronous>, transform_indices = @transform_4, window_bounds = array<i64: 1, 128>}, {pipeline_mode = #tpu.pipeline_mode<synchronous>, transform_indices = @transform_5, window_bounds = array<i64: 128, 128>}, {pipeline_mode = #tpu.pipeline_mode<synchronous>, transform_indices = @transform_6, window_bounds = array<i64: 1, 128>}, {transform_indices = @transform_7, window_bounds = array<i64: 8, 16>}]} {
    %c0 = arith.constant 0 : index
    %c0_0 = arith.constant 0 : index
    %0 = vector.load %arg1[%c0, %c0_0] : memref<8x32xf32, #tpu.memory_space<vmem>>, vector<8x32xf32>
    %c0_1 = arith.constant 0 : index
    %c0_2 = arith.constant 0 : index
    %1 = vector.load %arg2[%c0_1, %c0_2] : memref<8x32xf32, #tpu.memory_space<vmem>>, vector<8x32xf32>
    %2 = arith.mulf %0, %1 : vector<8x32xf32>
    %3 = arith.subf %0, %1 : vector<8x32xf32>
    %4 = math.absf %3 : vector<8x32xf32>
    %c0_3 = arith.constant 0 : index
    %c0_4 = arith.constant 0 : index
    %5 = vector.load %arg3[%c0_3, %c0_4] : memref<32x128xf32, #tpu.memory_space<vmem>>, vector<32x128xf32>
    %cst = arith.constant dense<0.000000e+00> : vector<8x128xf32>
    %6 = tpu.matmul %2, %5, %cst {dimension_numbers = #tpu.dot_dimension_numbers<[1], [0], [0], [1], [0, 0, 1, 1], [], []>, precision = #tpu.contract_precision<fp32>} : vector<8x32xf32>, vector<32x128xf32>, vector<8x128xf32> -> vector<8x128xf32>
    %c0_5 = arith.constant 0 : index
    %c0_6 = arith.constant 0 : index
    %7 = vector.load %arg4[%c0_5, %c0_6] : memref<32x128xf32, #tpu.memory_space<vmem>>, vector<32x128xf32>
    %cst_7 = arith.constant dense<0.000000e+00> : vector<8x128xf32>
    %8 = tpu.matmul %4, %7, %cst_7 {dimension_numbers = #tpu.dot_dimension_numbers<[1], [0], [0], [1], [0, 0, 1, 1], [], []>, precision = #tpu.contract_precision<fp32>} : vector<8x32xf32>, vector<32x128xf32>, vector<8x128xf32> -> vector<8x128xf32>
    %9 = arith.addf %6, %8 : vector<8x128xf32>
    %c0_8 = arith.constant 0 : index
    %c0_9 = arith.constant 0 : index
    %10 = vector.load %arg5[%c0_8, %c0_9] : memref<1x128xf32, #tpu.memory_space<vmem>>, vector<1x128xf32>
    %11 = vector.broadcast %10 : vector<1x128xf32> to vector<8x128xf32>
    %12 = arith.addf %9, %11 : vector<8x128xf32>
    %cst_10 = arith.constant 0.000000e+00 : f32
    %13 = vector.broadcast %cst_10 : f32 to vector<8x128xf32>
    %14 = arith.maximumf %12, %13 : vector<8x128xf32>
    %c0_11 = arith.constant 0 : index
    %c0_12 = arith.constant 0 : index
    %15 = vector.load %arg6[%c0_11, %c0_12] : memref<128x128xf32, #tpu.memory_space<vmem>>, vector<128x128xf32>
    %cst_13 = arith.constant dense<0.000000e+00> : vector<8x128xf32>
    %16 = tpu.matmul %14, %15, %cst_13 {dimension_numbers = #tpu.dot_dimension_numbers<[1], [0], [0], [1], [0, 0, 1, 1], [], []>, precision = #tpu.contract_precision<fp32>} : vector<8x128xf32>, vector<128x128xf32>, vector<8x128xf32> -> vector<8x128xf32>
    %c0_14 = arith.constant 0 : index
    %c0_15 = arith.constant 0 : index
    %17 = vector.load %arg7[%c0_14, %c0_15] : memref<1x128xf32, #tpu.memory_space<vmem>>, vector<1x128xf32>
    %18 = vector.broadcast %17 : vector<1x128xf32> to vector<8x128xf32>
    %19 = arith.addf %16, %18 : vector<8x128xf32>
    %20 = vector.extract_strided_slice %19 {offsets = [0, 0], sizes = [8, 16], strides = [1, 1]} : vector<8x128xf32> to vector<8x16xf32>
    %c0_16 = arith.constant 0 : index
    %c0_17 = arith.constant 0 : index
    %21 = vector.load %arg8[%c0_16, %c0_17] : memref<8x16xf32, #tpu.memory_space<vmem>>, vector<8x16xf32>
    tpu.vector_store %arg8[%c0_16, %c0_17], %20 {strides = array<i32>} : memref<8x16xf32, #tpu.memory_space<vmem>>, vector<8x16xf32>,
    return
  }
  func.func @transform_0(%arg0: i32) -> (i32, i32) {
    %c0_i32 = arith.constant 0 : i32
    %c0_i32_0 = arith.constant 0 : i32
    return %arg0, %c0_i32 : i32, i32
  }
  func.func @transform_1(%arg0: i32) -> (i32, i32) {
    %c0_i32 = arith.constant 0 : i32
    %c0_i32_0 = arith.constant 0 : i32
    return %arg0, %c0_i32 : i32, i32
  }
  func.func @transform_2(%arg0: i32) -> (i32, i32) {
    %c0_i32 = arith.constant 0 : i32
    %c0_i32_0 = arith.constant 0 : i32
    %c0_i32_1 = arith.constant 0 : i32
    return %c0_i32, %c0_i32_0 : i32, i32
  }
  func.func @transform_3(%arg0: i32) -> (i32, i32) {
    %c0_i32 = arith.constant 0 : i32
    %c0_i32_0 = arith.constant 0 : i32
    %c0_i32_1 = arith.constant 0 : i32
    return %c0_i32, %c0_i32_0 : i32, i32
  }
  func.func @transform_4(%arg0: i32) -> (i32, i32) {
    %c0_i32 = arith.constant 0 : i32
    %c0_i32_0 = arith.constant 0 : i32
    %c0_i32_1 = arith.constant 0 : i32
    return %c0_i32, %c0_i32_0 : i32, i32
  }
  func.func @transform_5(%arg0: i32) -> (i32, i32) {
    %c0_i32 = arith.constant 0 : i32
    %c0_i32_0 = arith.constant 0 : i32
    %c0_i32_1 = arith.constant 0 : i32
    return %c0_i32, %c0_i32_0 : i32, i32
  }
  func.func @transform_6(%arg0: i32) -> (i32, i32) {
    %c0_i32 = arith.constant 0 : i32
    %c0_i32_0 = arith.constant 0 : i32
    %c0_i32_1 = arith.constant 0 : i32
    return %c0_i32, %c0_i32_0 : i32, i32
  }
  func.func @transform_7(%arg0: i32) -> (i32, i32) {
    %c0_i32 = arith.constant 0 : i32
    %c0_i32_0 = arith.constant 0 : i32
    return %arg0, %c0_i32 : i32, i32
  }
}

</mosaic_0001>

<bundles_post_ra>
// kernel: tpu_custom_call.1
= control target key start
LH: loop header
LB: loop body
LE: loop exit
PB: predicated region body
PF: predicated region fallthrough
CT: control target
= control target key end

     0   :  { %12 = vsyncpa [#allocation3], 0  ;;  %s3169_s0 = inlined_call_operand.hbm [shape: f32[8,32], index: 0, kind: input, shape index: {}]   ;;  %s3170_s1 = inlined_call_operand.hbm [shape: f32[8,32], index: 1, kind: input, shape index: {}]   ;;  %s3171_s2 = inlined_call_operand.hbm [shape: f32[32,128], index: 2, kind: input, shape index: {}]   ;;  %s3172_s3 = inlined_call_operand.hbm [shape: f32[32,128], index: 3, kind: input, shape index: {}]   ;;  %s3173_s4 = inlined_call_operand.vmem [shape: f32[1,128], index: 4, kind: input, shape index: {}]   ;;  %s3174_s5 = inlined_call_operand.hbm [shape: f32[128,128], index: 5, kind: input, shape index: {}]   ;;  %s3175_s6 = inlined_call_operand.vmem [shape: f32[1,128], index: 6, kind: input, shape index: {}]   ;;  %s3176_s7 = inlined_call_operand.hbm [shape: f32[8,16], index: 7, kind: output, shape index: {}]  }
   0x1   :  { %13 = vsyncpa [#allocation6], 0 }
   0x2   :  { %14 = vsyncpa [#allocation9], 0 }
   0x3   :  { %15 = vsyncpa [#allocation4], 0  ;;  %s2656_s24 = smov [#allocation5]   ;;  %s2516_s28 = scalar_lea.hbm %s3170_s1, 128 }
   0x4   :  { %s32_s25 = sshll.u32 %s2656_s24, 4  ;;  %p2517_p0 = scmp.ne.s32.totalorder %s3170_s1, %s2516_s28  ;;  %s33_s25 = int_to_ptr.vmem [resolvable:$true] %s32_s25 }
   0x5   :  { %p2520_p1 = scmp.lt.u32.totalorder %s2516_s28, %s3170_s1 }
   0x7   :  { %p2522_p2 = pnand %p2520_p1, %p2517_p0 }
   0x9   :  { %2525 = shalt.err (!%p2522_p2)
}
   0xa   :  { %s2526_s10 = scalar_lea.vmem %s33_s25, 128  ;;  %p2531_p4 = scmp.lt.s32.totalorder %s33_s25, %s33_s25 }
   0xb   :  { %p2527_p3 = scmp.ne.s32.totalorder %s33_s25, %s2526_s10  ;;  %p2532_p5 = scmp.lt.s32.totalorder %s2526_s10, %s2526_s10 }
   0xd   :  { %p2533_p6 = por %p2532_p5, %p2531_p4 }
   0xf   :  { %p2534_p7 = pnand %p2533_p6, %p2527_p3 }
  0x11   :  { %2537 = shalt.err (!%p2534_p7)
}
  0x12   :  { %35 = dma.hbm_to_vmem [thread:$0]  %s3170_s1, 128, %s33_s25, [#allocation6]  }
  0x13   :  { %s2657_s13 = smov [#allocation8]   ;;  %s2658_s15 = smov [#allocation2]  }
  0x14   :  { %s53_s14 = sshll.u32 %s2657_s13, 4  ;;  %s22_s16 = sshll.u32 %s2658_s15, 4  ;;  %s54_s14 = int_to_ptr.vmem [resolvable:$true] %s53_s14  ;;  %s23_s16 = int_to_ptr.vmem [resolvable:$true] %s22_s16 }
  0x15   :  { %s2538_s19 = scalar_lea.hbm %s3172_s3, 512 }
  0x16   :  { %p2539_p8 = scmp.ne.s32.totalorder %s3172_s3, %s2538_s19  ;;  %p2542_p9 = scmp.lt.u32.totalorder %s2538_s19, %s3172_s3 }
  0x18   :  { %p2544_p10 = pnand %p2542_p9, %p2539_p8 }
  0x1a   :  { %2547 = shalt.err (!%p2544_p10)
}
  0x1b   :  { %s2548_s1 = scalar_lea.vmem %s54_s14, 512  ;;  %p2553_p12 = scmp.lt.s32.totalorder %s54_s14, %s54_s14 }
  0x1c   :  { %p2549_p11 = scmp.ne.s32.totalorder %s54_s14, %s2548_s1  ;;  %p2554_p13 = scmp.lt.s32.totalorder %s2548_s1, %s2548_s1 }
  0x1e   :  { %p2555_p0 = por %p2554_p13, %p2553_p12 }
  0x20   :  { %p2556_p1 = pnand %p2555_p0, %p2549_p11 }
  0x22   :  { %2559 = shalt.err (!%p2556_p1)
}
  0x23   :  { %s2659_s24 = smov 128   ;;  %s2660_s25 = smov 8  }
  0x24   :  { %59 = dma.hbm_to_vmem [thread:$0]  %s3172_s3, 512, %s54_s14, [#allocation9], %s2659_s24, %s2659_s24, %s2660_s25  }
  0x25   :  { %s2560_s30 = scalar_lea.hbm %s3169_s0, 128 }
  0x26   :  { %p2561_p2 = scmp.ne.s32.totalorder %s3169_s0, %s2560_s30  ;;  %p2564_p3 = scmp.lt.u32.totalorder %s2560_s30, %s3169_s0 }
  0x28   :  { %p2566_p4 = pnand %p2564_p3, %p2561_p2 }
  0x2a   :  { %2569 = shalt.err (!%p2566_p4)
}
  0x2b   :  { %s2570_s12 = scalar_lea.vmem %s23_s16, 128  ;;  %p2575_p6 = scmp.lt.s32.totalorder %s23_s16, %s23_s16 }
  0x2c   :  { %p2571_p5 = scmp.ne.s32.totalorder %s23_s16, %s2570_s12  ;;  %p2576_p7 = scmp.lt.s32.totalorder %s2570_s12, %s2570_s12 }
  0x2e   :  { %p2577_p8 = por %p2576_p7, %p2575_p6 }
  0x30   :  { %p2578_p9 = pnand %p2577_p8, %p2571_p5 }
  0x32   :  { %2581 = shalt.err (!%p2578_p9)
}
  0x33   :  { %25 = dma.hbm_to_vmem [thread:$0]  %s3169_s0, 128, %s23_s16, [#allocation3]  }
  0x34   :  { %s2661_s14 = smov [#allocation7]   ;;  %s2662_s17 = smov [#allocation10]  }
  0x35   :  { %s41_s15 = sshll.u32 %s2661_s14, 4  ;;  %s67_s18 = sshll.u32 %s2662_s17, 4  ;;  %s42_s15 = int_to_ptr.vmem [resolvable:$true] %s41_s15  ;;  %s68_s18 = int_to_ptr.vmem [resolvable:$true] %s67_s18 }
  0x36   :  { %s2582_s21 = scalar_lea.hbm %s3171_s2, 512 }
  0x37   :  { %p2583_p10 = scmp.ne.s32.totalorder %s3171_s2, %s2582_s21  ;;  %p2586_p11 = scmp.lt.u32.totalorder %s2582_s21, %s3171_s2 }
  0x39   :  { %p2588_p12 = pnand %p2586_p11, %p2583_p10 }
  0x3b   :  { %2591 = shalt.err (!%p2588_p12)
}
  0x3c   :  { %s2592_s0 = scalar_lea.vmem %s42_s15, 512  ;;  %p2597_p0 = scmp.lt.s32.totalorder %s42_s15, %s42_s15 }
  0x3d   :  { %p2593_p13 = scmp.ne.s32.totalorder %s42_s15, %s2592_s0  ;;  %p2598_p1 = scmp.lt.s32.totalorder %s2592_s0, %s2592_s0 }
  0x3f   :  { %p2599_p2 = por %p2598_p1, %p2597_p0 }
  0x41   :  { %p2600_p3 = pnand %p2599_p2, %p2593_p13 }
  0x43   :  { %2603 = shalt.err (!%p2600_p3)
}
  0x44   :  { %47 = dma.hbm_to_vmem [thread:$0]  %s3171_s2, 512, %s42_s15, [#allocation6], %s2659_s24, %s2659_s24, %s2660_s25  }
  0x45   :  { %s2604_s30 = scalar_lea.hbm %s3174_s5, 2048 }
  0x46   :  { %p2605_p4 = scmp.ne.s32.totalorder %s3174_s5, %s2604_s30  ;;  %p2608_p5 = scmp.lt.u32.totalorder %s2604_s30, %s3174_s5 }
  0x48   :  { %p2610_p6 = pnand %p2608_p5, %p2605_p4 }
  0x4a   :  { %2613 = shalt.err (!%p2610_p6)
}
  0x4b   :  { %s2614_s12 = scalar_lea.vmem %s68_s18, 2048  ;;  %p2619_p8 = scmp.lt.s32.totalorder %s68_s18, %s68_s18 }
  0x4c   :  { %p2615_p7 = scmp.ne.s32.totalorder %s68_s18, %s2614_s12  ;;  %p2620_p9 = scmp.lt.s32.totalorder %s2614_s12, %s2614_s12 }
  0x4e   :  { %p2621_p10 = por %p2620_p9, %p2619_p8 }
  0x50   :  { %p2622_p11 = pnand %p2621_p10, %p2615_p7 }
  0x52   :  { %2625 = shalt.err (!%p2622_p11)
}
  0x53   :  { %73 = dma.hbm_to_vmem [thread:$0]  %s3174_s5, 2048, %s68_s18, [#allocation9], %s2659_s24, %s2659_s24, %s2660_s25  }
  0x54   :  { %2648 = dma.done.wait [#allocation3], 128  }
  0x55   :  { %2649 = vsyncadd [#allocation3], 4294967168 }
  0x56   :  { %2650 = dma.done.wait [#allocation6], 640  }
  0x57   :  { %2651 = vsyncadd [#allocation6], 4294966656 }
  0x58   :  { %2652 = dma.done.wait [#allocation9], 2560  }
  0x59   :  { %2653 = vsyncadd [#allocation9], 4294964736  ;;  %v2663_v0 = vmov 0.0|0.0   ;;  %vm2664_vm0 = vmmov 0   ;;  %v2665_v1 = vmov 0.0   ;;  %v100_v2 = vld [vmem:[#allocation8] sm:$0xff] }
  0x5a   :  { %2279 = vmatprep.subr.bf16.mxu0 %v2663_v0  ;;  %2285 = vmatprep.subr.bf16.mxu1 %v2663_v0  ;;  %v101_v3 = vld [vmem:[#allocation8 + $0x8] sm:$0xff]  ;;  %v102_v4 = vld [vmem:[#allocation8 + $0x10] sm:$0xff]  ;;  %v109_v5 = vand.u32 4294901760, %v100_v2  ;;  %v103_v7 = vld [vmem:[#allocation8 + $0x18] sm:$0xff]  ;;  %vm104_vm1 = vcmask 261120   ;;  %s2666_s13 = smov [#allocation11]  }
  0x5b   :  { %1945 = vmatprep.mubr.msk.f32.mxu0 %vm2664_vm0, %v2665_v1  ;;  %1956 = vmatprep.mubr.msk.f32.mxu1 %vm2664_vm0, %v2665_v1  ;;  %v112_v6 = vand.u32 4294901760, %v101_v3  ;;  %v115_v8 = vand.u32 4294901760, %v102_v4  ;;  %v91_v9 = vld [vmem:[#allocation2] sm:$0xff]  ;;  %v92_v10 = vld [vmem:[#allocation5] sm:$0xff]  ;;  %v118_v11 = vand.u32 4294901760, %v103_v7  ;;  %v96_v35 = vld [vmem:[#allocation7] sm:$0xff] }
  0x5c   :  { %v94_v12 = vsub.f32 %v91_v9, %v92_v10  ;;  %v2784_v14 = vsub.f32 %v100_v2, %v109_v5  ;;  %v97_v36 = vld [vmem:[#allocation7 + $0x8] sm:$0xff]  ;;  %v93_v39 = vmul.f32 %v92_v10, %v91_v9  ;;  %v597_v42 = vand.u32 4294901760, %v96_v35  ;;  %v98_v45 = vld [vmem:[#allocation7 + $0x10] sm:$0xff]  ;;  %v99_v46 = vld [vmem:[#allocation7 + $0x18] sm:$0xff]  ;;  %s1762_s14 = sshll.u32 %s2666_s13, 4  ;;  %s1763_s14 = int_to_ptr.vmem [resolvable:$true] %s1762_s14 }
  0x5d   :  { %v2782_v13 = vpack.c.bf16 %v112_v6, %v109_v5  ;;  %v196_v15 = vsub.f32 %v101_v3, %v112_v6  ;;  %v2786_v16 = vsub.f32 %v102_v4, %v115_v8  ;;  %v2788_v17 = vsub.f32 %v103_v7, %v118_v11  ;;  %s2626_s15 = scalar_lea.vmem %s1763_s14, 128  ;;  %p2631_p13 = scmp.lt.s32.totalorder %s1763_s14, %s1763_s14 }
  0x5e   :  { %v95_v18 = vand.u32 2147483647, %v94_v12  ;;  %v2791_v19 = vpack.c.bf16 %v118_v11, %v115_v8  ;;  %v190_v20 = vand.u32 4294901760, %v2784_v14  ;;  %v600_v43 = vand.u32 4294901760, %v97_v36  ;;  %p2627_p12 = scmp.ne.s32.totalorder %s1763_s14, %s2626_s15  ;;  %p2632_p0 = scmp.lt.s32.totalorder %s2626_s15, %s2626_s15 }
  0x5f   :  { %2281 = vmatpush3.bf16.msra.mxu0 %v2782_v13  ;;  %v197_v21 = vand.u32 4294901760, %v196_v15  ;;  %v204_v23 = vand.u32 4294901760, %v2786_v16  ;;  %v211_v24 = vand.u32 4294901760, %v2788_v17  ;;  %v2292_v44 = vpack.c.bf16 %v196_v15, %v2784_v14 }
  0x60   :  { %2282 = vmatprep.subr.bf16.mxu0 %v2663_v0  ;;  %v106_v22 = vsel %vm104_vm1, %v95_v18, 0  ;;  %v191_v25 = vsub.f32 %v2784_v14, %v190_v20  ;;  %v594_v48 = vsel %vm104_vm1, %v93_v39, 0  ;;  %v2809_v49 = vsub.f32 %v96_v35, %v597_v42  ;;  %v1094_v35 = vld [vmem:[#allocation10 + $0x20] sm:$0xff]  ;;  %p2633_p1 = por %p2632_p0, %p2631_p13 }
  0x61   :  { %v198_v26 = vsub.f32 %v196_v15, %v197_v21  ;;  %v2799_v27 = vand.u32 4294901760, %v106_v22  ;;  %v205_v28 = vsub.f32 %v2786_v16, %v204_v23  ;;  %v212_v29 = vsub.f32 %v2788_v17, %v211_v24 }
  0x62   :  { %v192_v30 = vand.u32 4294901760, %v191_v25  ;;  %v2811_v50 = vsub.f32 %v97_v36, %v600_v43  ;;  %v603_v51 = vand.u32 4294901760, %v98_v45  ;;  %v606_v52 = vand.u32 4294901760, %v99_v46  ;;  %v1095_v36 = vld [vmem:[#allocation10 + $0x28] sm:$0xff]  ;;  %p2634_p2 = pnand %p2633_p1, %p2627_p12 }
  0x63   :  { %2284 = vmatpush3.bf16.msra.mxu0 %v2791_v19  ;;  %v199_v31 = vand.u32 4294901760, %v198_v26  ;;  %v178_v32 = vsub.f32 %v106_v22, %v2799_v27  ;;  %v206_v33 = vand.u32 4294901760, %v205_v28  ;;  %v213_v34 = vand.u32 4294901760, %v212_v29  ;;  %v1091_v22 = vld [vmem:[#allocation10 + $0x8] sm:$0xff]  ;;  %v1092_v28 = vld [vmem:[#allocation10 + $0x10] sm:$0xff]  ;;  %v1093_v29 = vld [vmem:[#allocation10 + $0x18] sm:$0xff] }
  0x64   :  { %2291 = vmatprep.subr.bf16.mxu0 %v2663_v0  ;;  %v2295_v53 = vpack.c.bf16 %v2788_v17, %v2786_v16  ;;  %v2819_v54 = vand.u32 4294901760, %v594_v48  ;;  %v2825_v55 = vsub.f32 %v98_v45, %v603_v51  ;;  %v2827_v56 = vsub.f32 %v99_v46, %v606_v52 }
  0x65   :  { %v2286_v37 = vpack.c.bf16 %v199_v31, %v192_v30  ;;  %v179_v38 = vand.u32 4294901760, %v178_v32  ;;  %v2289_v41 = vpack.c.bf16 %v213_v34, %v206_v33  ;;  %v678_v57 = vand.u32 4294901760, %v2809_v49 }
  0x66   :  { %v685_v58 = vand.u32 4294901760, %v2811_v50  ;;  %v2304_v59 = vpack.c.bf16 %v197_v21, %v190_v20  ;;  %v2834_v60 = vsub.f32 %v594_v48, %v2819_v54  ;;  %v692_v63 = vand.u32 4294901760, %v2825_v55  ;;  %v1090_v21 = vld [vmem:[#allocation10] sm:$0xff] }
  0x67   :  { %2287 = vmatpush3.bf16.msra.mxu1 %v2286_v37  ;;  %v180_v40 = vsub.f32 %v178_v32, %v179_v38  ;;  %v679_v61 = vsub.f32 %v2809_v49, %v678_v57  ;;  %v699_v2 = vand.u32 4294901760, %v2827_v56  ;;  %v2307_v3 = vpack.c.bf16 %v211_v24, %v204_v23 }
  0x68   :  { %2288 = vmatprep.subr.bf16.mxu1 %v2663_v0  ;;  %v686_v62 = vsub.f32 %v2811_v50, %v685_v58  ;;  %v667_v4 = vand.u32 4294901760, %v2834_v60  ;;  %v693_v7 = vsub.f32 %v2825_v55, %v692_v63  ;;  %v2316_v9 = vpack.c.bf16 %v600_v43, %v597_v42  ;;  %v1096_v42 = vld [vmem:[#allocation10 + $0x30] sm:$0xff]  ;;  %v1097_v43 = vld [vmem:[#allocation10 + $0x38] sm:$0xff] }
  0x69   :  { %v181_v47 = vand.u32 4294901760, %v180_v40  ;;  %v680_v5 = vand.u32 4294901760, %v679_v61  ;;  %v700_v8 = vsub.f32 %v2827_v56, %v699_v2  ;;  %v2319_v14 = vpack.c.bf16 %v606_v52, %v603_v51  ;;  %v1102_v61 = vld [vmem:[#allocation10 + $0x60] sm:$0xff] }
  0x6a   :  { %v687_v6 = vand.u32 4294901760, %v686_v62  ;;  %v668_v11 = vsub.f32 %v2834_v60, %v667_v4  ;;  %v694_v12 = vand.u32 4294901760, %v693_v7  ;;  %v2328_v17 = vpack.c.bf16 %v2811_v50, %v2809_v49  ;;  %v1098_v49 = vld [vmem:[#allocation10 + $0x40] sm:$0xff]  ;;  %v1099_v50 = vld [vmem:[#allocation10 + $0x48] sm:$0xff] }
  0x6b   :  { %1946 = vmatmul.mubr.f32.vlgmr.msra.gmra.mrb[0].mxu0 %v181_v47  ;;  %2290 = vmatpush3.bf16.msra.mxu1 %v2289_v41  ;;  %v2331_v18 = vpack.c.bf16 %v2827_v56, %v2825_v55  ;;  %v2343_v20 = vpack.c.bf16 %v699_v2, %v692_v63  ;;  %v1114_v23 = vand.u32 4294901760, %v1090_v21  ;;  %v1117_v24 = vand.u32 4294901760, %v1091_v22  ;;  %v1100_v56 = vld [vmem:[#allocation10 + $0x50] sm:$0xff]  ;;  %v1103_v62 = vld [vmem:[#allocation10 + $0x68] sm:$0xff] }
  0x6c   :  { %2293 = vmatpush3.bf16.msra.mxu0 %v2292_v44  ;;  %2297 = vmatprep.subr.bf16.mxu1 %v2663_v0  ;;  %v2322_v10 = vpack.c.bf16 %v687_v6, %v680_v5  ;;  %v669_v15 = vand.u32 4294901760, %v668_v11  ;;  %v1120_v30 = vand.u32 4294901760, %v1092_v28  ;;  %v1123_v31 = vand.u32 4294901760, %v1093_v29  ;;  %v1105_v5 = vld [vmem:[#allocation10 + $0x78] sm:$0xff] }
  0x6d   :  { %2294 = vmatprep.subr.bf16.mxu0 %v2663_v0  ;;  %1967 = vmatprep.mubr.msk.f32.mxu0 %vm2664_vm0, %v2665_v1  ;;  %v2894_v25 = vpack.c.bf16 %v1117_v24, %v1114_v23  ;;  %v2896_v26 = vsub.f32 %v1090_v21, %v1114_v23  ;;  %v1126_v37 = vand.u32 4294901760, %v1094_v35  ;;  %v1132_v44 = vand.u32 4294901760, %v1096_v42 }
  0x6e   :  { %1957 = vmatmul.mubr.f32.vlgmr.msra.gmra.mrb[0].mxu1 %v2799_v27  ;;  %v2906_v33 = vsub.f32 %v1092_v28, %v1120_v30  ;;  %v2908_v34 = vsub.f32 %v1093_v29, %v1123_v31  ;;  %v1135_v45 = vand.u32 4294901760, %v1097_v43  ;;  %v1138_v51 = vand.u32 4294901760, %v1098_v49 }
  0x6f   :  { %2299 = vmatpush3.bf16.msra.mxu1 %v2782_v13  ;;  %1978 = vmatprep.mubr.msk.f32.mxu1 %vm2664_vm0, %v2665_v1  ;;  %v2916_v40 = vsub.f32 %v1094_v35, %v1126_v37  ;;  %v2926_v47 = vsub.f32 %v1096_v42, %v1132_v44  ;;  %v1141_v52 = vand.u32 4294901760, %v1099_v50  ;;  %v1150_v63 = vand.u32 4294901760, %v1102_v61 }
  0x70   :  { %2296 = vmatpush3.bf16.msra.mxu0 %v2295_v53  ;;  %2300 = vmatprep.subr.bf16.mxu1 %v2663_v0  ;;  %v2924_v46 = vpack.c.bf16 %v1135_v45, %v1132_v44  ;;  %v2928_v48 = vsub.f32 %v1097_v43, %v1135_v45  ;;  %v1153_v2 = vand.u32 4294901760, %v1103_v62  ;;  %v1159_v7 = vand.u32 4294901760, %v1105_v5 }
  0x71   :  { %2303 = vmatprep.subr.bf16.mxu0 %v2663_v0  ;;  %v2934_v53 = vpack.c.bf16 %v1141_v52, %v1138_v51  ;;  %v2938_v55 = vsub.f32 %v1099_v50, %v1141_v52  ;;  %v1228_v23 = vand.u32 4294901760, %v2908_v34  ;;  %v1249_v50 = vand.u32 4294901760, %v2926_v47 }
  0x72   :  { %v2962_v11 = vsub.f32 %v1103_v62, %v1153_v2  ;;  %vm1754_vm2 = vcmask 130048  }
  0x73   :  { %1968 = vmatmul.mubr.f32.vlgmr.msra.gmra.mrb[2].mxu0 %v178_v32  ;;  %2302 = vmatpush3.bf16.msra.mxu1 %v2791_v19  ;;  %v2904_v32 = vpack.c.bf16 %v1123_v31, %v1120_v30  ;;  %v1229_v30 = vsub.f32 %v2908_v34, %v1228_v23 }
  0x74   :  { %2305 = vmatpush3.bf16.msra.mxu0 %v2304_v59  ;;  %2309 = vmatprep.subr.bf16.mxu1 %v2663_v0 }
  0x75   :  { %2306 = vmatprep.subr.bf16.mxu0 %v2663_v0  ;;  %1989 = vmatprep.mubr.msk.f32.mxu0 %vm2664_vm0, %v2665_v1  ;;  %v1230_v35 = vand.u32 4294901760, %v1229_v30 }
  0x76   :  { %1979 = vmatmul.mubr.f32.vlgmr.msra.gmra.mrb[2].mxu1 %v179_v38  ;;  %v1129_v38 = vand.u32 4294901760, %v1095_v36 }
  0x77   :  { %2311 = vmatpush3.bf16.msra.mxu1 %v2782_v13  ;;  %2000 = vmatprep.mubr.msk.f32.mxu1 %vm2664_vm0, %v2665_v1  ;;  %v701_v13 = vand.u32 4294901760, %v700_v8 }
  0x78   :  { %2308 = vmatpush3.bf16.msra.mxu0 %v2307_v3  ;;  %2312 = vmatprep.subr.bf16.mxu1 %v2663_v0  ;;  %v2914_v39 = vpack.c.bf16 %v1129_v38, %v1126_v37  ;;  %v2918_v41 = vsub.f32 %v1095_v36, %v1129_v38  ;;  %v2950_v3 = vpack.c.bf16 %v1153_v2, %v1150_v63  ;;  %v1235_v36 = vand.u32 4294901760, %v2916_v40 }
  0x79   :  { %2315 = vmatprep.subr.bf16.mxu0 %v2663_v0  ;;  %v2325_v16 = vpack.c.bf16 %v701_v13, %v694_v12 }
  0x7a   :  { %v1242_v37 = vand.u32 4294901760, %v2918_v41  ;;  %v1236_v43 = vsub.f32 %v2916_v40, %v1235_v36 }
  0x7b   :  { %1990 = vmatmul.mubr.f32.vlgmr.msra.gmra.mrb[4].mxu0 %v2799_v27  ;;  %2314 = vmatpush3.bf16.msra.mxu1 %v2791_v19  ;;  %v2340_v19 = vpack.c.bf16 %v685_v58, %v678_v57  ;;  %v1101_v57 = vld [vmem:[#allocation10 + $0x58] sm:$0xff]  ;;  %v1144_v58 = vand.u32 4294901760, %v1100_v56 }
  0x7c   :  { %2317 = vmatpush3.bf16.msra.mxu0 %v2316_v9  ;;  %2321 = vmatprep.subr.bf16.mxu1 %v2663_v0  ;;  %v1147_v59 = vand.u32 4294901760, %v1101_v57  ;;  %v2992_v42 = vpack.c.bf16 %v1242_v37, %v1235_v36  ;;  %v1243_v44 = vsub.f32 %v2918_v41, %v1242_v37  ;;  %v1237_v45 = vand.u32 4294901760, %v1236_v43 }
  0x7d   :  { %2318 = vmatprep.subr.bf16.mxu0 %v2663_v0  ;;  %2011 = vmatprep.mubr.msk.f32.mxu0 %vm2664_vm0, %v2665_v1  ;;  %v2956_v8 = vsub.f32 %v1100_v56, %v1144_v58 }
  0x7e   :  { %2001 = vmatmul.mubr.f32.vlgmr.msra.gmra.mrb[4].mxu1 %v2799_v27  ;;  %v2898_v27 = vsub.f32 %v1091_v22, %v1117_v24  ;;  %v1221_v22 = vand.u32 4294901760, %v2906_v33 }
  0x7f   :  { %2323 = vmatpush3.bf16.msra.mxu1 %v2322_v10  ;;  %2022 = vmatprep.mubr.msk.f32.mxu1 %vm2664_vm0, %v2665_v1  ;;  %v2960_v10 = vsub.f32 %v1102_v61, %v1150_v63  ;;  %v1270_v63 = vand.u32 4294901760, %v2938_v55 }
  0x80   :  { %2320 = vmatpush3.bf16.msra.mxu0 %v2319_v14  ;;  %2324 = vmatprep.subr.bf16.mxu1 %v2663_v0  ;;  %v2984_v28 = vpack.c.bf16 %v1228_v23, %v1221_v22  ;;  %v1222_v29 = vsub.f32 %v2906_v33, %v1221_v22 }
  0x81   :  { %2327 = vmatprep.subr.bf16.mxu0 %v2663_v0  ;;  %v1291_v30 = vand.u32 4294901760, %v2960_v10 }
  0x82   :  { %v1223_v31 = vand.u32 4294901760, %v1222_v29 }
  0x83   :  { %2012 = vmatmul.mubr.f32.vlgmr.msra.gmra.mrb[6].mxu0 %v669_v15  ;;  %2326 = vmatpush3.bf16.msra.mxu1 %v2325_v16  ;;  %v1207_v15 = vand.u32 4294901760, %v2896_v26  ;;  %v1214_v16 = vand.u32 4294901760, %v2898_v27  ;;  %v1292_v37 = vsub.f32 %v2960_v10, %v1291_v30 }
  0x84   :  { %2329 = vmatpush3.bf16.msra.mxu0 %v2328_v17  ;;  %2333 = vmatprep.subr.bf16.mxu1 %v2663_v0  ;;  %v2990_v38 = vpack.c.bf16 %v1230_v35, %v1223_v31  ;;  %v1298_v31 = vand.u32 4294901760, %v2962_v11 }
  0x85   :  { %2330 = vmatprep.subr.bf16.mxu0 %v2663_v0  ;;  %2033 = vmatprep.mubr.msk.f32.mxu0 %vm2664_vm0, %v2665_v1  ;;  %v2975_v17 = vpack.c.bf16 %v1214_v16, %v1207_v15 }
  0x86   :  { %2023 = vmatmul.mubr.f32.vlgmr.msra.gmra.mrb[6].mxu1 %v2819_v54  ;;  %v3024_v36 = vpack.c.bf16 %v1298_v31, %v1291_v30  ;;  %v1299_v43 = vsub.f32 %v2962_v11, %v1298_v31 }
  0x87   :  { %2335 = vmatpush3.bf16.msra.mxu1 %v2316_v9  ;;  %2044 = vmatprep.mubr.msk.f32.mxu1 %vm2664_vm0, %v2665_v1 }
  0x88   :  { %2332 = vmatpush3.bf16.msra.mxu0 %v2331_v18  ;;  %2336 = vmatprep.subr.bf16.mxu1 %v2663_v0  ;;  %v1208_v18 = vsub.f32 %v2896_v26, %v1207_v15 }
  0x89   :  { %2339 = vmatprep.subr.bf16.mxu0 %v2663_v0 }
  0x8b   :  { %2034 = vmatmul.mubr.f32.vlgmr.msra.gmra.mrb[8].mxu0 %v2834_v60  ;;  %2338 = vmatpush3.bf16.msra.mxu1 %v2319_v14  ;;  %v2944_v60 = vpack.c.bf16 %v1147_v59, %v1144_v58 }
  0x8c   :  { %2341 = vmatpush3.bf16.msra.mxu0 %v2340_v19  ;;  %2345 = vmatprep.subr.bf16.mxu1 %v2663_v0  ;;  %v1215_v19 = vsub.f32 %v2898_v27, %v1214_v16  ;;  %v1277_v16 = vand.u32 4294901760, %v2956_v8 }
  0x8d   :  { %2342 = vmatprep.subr.bf16.mxu0 %v2663_v0  ;;  %2055 = vmatprep.mubr.msk.f32.mxu0 %vm2664_vm0, %v2665_v1 }
  0x8e   :  { %2045 = vmatmul.mubr.f32.vlgmr.msra.gmra.mrb[8].mxu1 %v667_v4  ;;  %v1104_v4 = vld [vmem:[#allocation10 + $0x70] sm:$0xff]  ;;  %v1216_v21 = vand.u32 4294901760, %v1215_v19 }
  0x8f   :  { %2347 = vmatpush3.bf16.msra.mxu1 %v2316_v9  ;;  %2066 = vmatprep.mubr.msk.f32.mxu1 %vm2664_vm0, %v2665_v1  ;;  %v1156_v6 = vand.u32 4294901760, %v1104_v4  ;;  %v2958_v9 = vsub.f32 %v1101_v57, %v1147_v59  ;;  %v1250_v57 = vsub.f32 %v2926_v47, %v1249_v50 }
  0x90   :  { %2344 = vmatpush3.bf16.msra.mxu0 %v2343_v20  ;;  %2348 = vmatprep.subr.bf16.mxu1 %v2663_v0  ;;  %v1209_v20 = vand.u32 4294901760, %v1208_v18 }
  0x91   :  { %2423 = vmatprep.subr.bf16.mxu0 %v2663_v0  ;;  %v2964_v12 = vpack.c.bf16 %v1159_v7, %v1156_v6  ;;  %v2966_v13 = vsub.f32 %v1104_v4, %v1156_v6  ;;  %v1251_v59 = vand.u32 4294901760, %v1250_v57  ;;  %v1271_v6 = vsub.f32 %v2938_v55, %v1270_v63 }
  0x92   :  { %v2982_v24 = vpack.c.bf16 %v1216_v21, %v1209_v20  ;;  %v1284_v18 = vand.u32 4294901760, %v2958_v9  ;;  %v1278_v21 = vsub.f32 %v2956_v8, %v1277_v16 }
  0x93   :  { %2056 = vmatmul.mubr.f32.vlgmr.msra.gmra.mrb[10].mxu0 %v2819_v54  ;;  %2350 = vmatpush3.bf16.msra.mxu1 %v2319_v14  ;;  %v2968_v14 = vsub.f32 %v1105_v5, %v1159_v7  ;;  %v1272_v15 = vand.u32 4294901760, %v1271_v6 }
  0x94   :  { %2351 = vmatprep.subr.bf16.mxu1 %v2663_v0  ;;  %2206 = vmatprep.mubr.msk.f32.mxu0 %vm2664_vm0, %v2665_v1  ;;  %v3016_v20 = vpack.c.bf16 %v1284_v18, %v1277_v16  ;;  %v1285_v22 = vsub.f32 %v2958_v9, %v1284_v18  ;;  %v1279_v23 = vand.u32 4294901760, %v1278_v21 }
  0x95   :  { %2425 = vmatpush3.bf16.msra.mxu0 %v2894_v25 }
  0x96   :  { %2067 = vmatmul.mubr.f32.vlgmr.msra.gmra.mrb[10].mxu1 %v2819_v54  ;;  %2426 = vmatprep.subr.bf16.mxu0 %v2663_v0  ;;  %v2936_v54 = vsub.f32 %v1098_v49, %v1138_v51  ;;  %v1244_v49 = vand.u32 4294901760, %v1243_v44  ;;  %v1256_v51 = vand.u32 4294901760, %v2928_v48  ;;  %v1286_v29 = vand.u32 4294901760, %v1285_v22 }
  0x97   :  { %2101 = vmatprep.mubr.msk.f32.mxu1 %vm2664_vm0, %v2665_v1  ;;  %2353 = vmatpush3.bf16.msra.mxu1 %v2894_v25  ;;  %v1293_v44 = vand.u32 4294901760, %v1292_v37 }
  0x98   :  { %2354 = vmatprep.subr.bf16.mxu1 %v2663_v0  ;;  %v2998_v52 = vpack.c.bf16 %v1244_v49, %v1237_v45  ;;  %v3000_v56 = vpack.c.bf16 %v1256_v51, %v1249_v50  ;;  %v1257_v58 = vsub.f32 %v2928_v48, %v1256_v51  ;;  %v1263_v62 = vand.u32 4294901760, %v2936_v54 }
  0x99   :  { %2428 = vmatpush3.bf16.msra.mxu0 %v2904_v32  ;;  %v3022_v35 = vpack.c.bf16 %v1286_v29, %v1279_v23  ;;  %v1300_v45 = vand.u32 4294901760, %v1299_v43  ;;  %v1305_v49 = vand.u32 4294901760, %v2966_v13  ;;  %v1312_v50 = vand.u32 4294901760, %v2968_v14 }
  0x9a   :  { %2429 = vmatprep.subr.bf16.mxu0 %v2663_v0  ;;  %v1258_v61 = vand.u32 4294901760, %v1257_v58  ;;  %v3008_v4 = vpack.c.bf16 %v1270_v63, %v1263_v62  ;;  %v1264_v5 = vsub.f32 %v2936_v54, %v1263_v62 }
  0x9b   :  { %2356 = vmatpush3.bf16.msra.mxu1 %v2904_v32  ;;  %v3030_v51 = vpack.c.bf16 %v1300_v45, %v1293_v44  ;;  %v3032_v57 = vpack.c.bf16 %v1312_v50, %v1305_v49  ;;  %v1306_v58 = vsub.f32 %v2966_v13, %v1305_v49 }
  0x9c   :  { %2357 = vmatprep.subr.bf16.mxu1 %v2663_v0  ;;  %v3006_v2 = vpack.c.bf16 %v1258_v61, %v1251_v59  ;;  %v1265_v7 = vand.u32 4294901760, %v1264_v5  ;;  %v1313_v59 = vsub.f32 %v2968_v14, %v1312_v50 }
  0x9d   :  { %2431 = vmatpush3.bf16.msra.mxu0 %v2914_v39  ;;  %v1307_v61 = vand.u32 4294901760, %v1306_v58 }
  0x9e   :  { %2432 = vmatprep.subr.bf16.mxu0 %v2663_v0  ;;  %v3014_v19 = vpack.c.bf16 %v1272_v15, %v1265_v7  ;;  %v1314_v62 = vand.u32 4294901760, %v1313_v59 }
  0x9f   :  { %2359 = vmatpush3.bf16.msra.mxu1 %v2914_v39 }
  0xa0   :  { %2360 = vmatprep.subr.bf16.mxu1 %v2663_v0  ;;  %v3036_v63 = vpack.c.bf16 %v1314_v62, %v1307_v61 }
  0xa1   :  { %2434 = vmatpush3.bf16.msra.mxu0 %v2924_v46 }
  0xa2   :  { %2435 = vmatprep.subr.bf16.mxu0 %v2663_v0 }
  0xa3   :  { %2362 = vmatpush3.bf16.msra.mxu1 %v2924_v46 }
  0xa4   :  { %2363 = vmatprep.subr.bf16.mxu1 %v2663_v0 }
  0xa5   :  { %2437 = vmatpush3.bf16.msra.mxu0 %v2934_v53 }
  0xa6   :  { %2438 = vmatprep.subr.bf16.mxu0 %v2663_v0 }
  0xa7   :  { %2365 = vmatpush3.bf16.msra.mxu1 %v2934_v53 }
  0xa8   :  { %2366 = vmatprep.subr.bf16.mxu1 %v2663_v0 }
  0xa9   :  { %2440 = vmatpush3.bf16.msra.mxu0 %v2944_v60 }
  0xaa   :  { %2441 = vmatprep.subr.bf16.mxu0 %v2663_v0 }
  0xab   :  { %2368 = vmatpush3.bf16.msra.mxu1 %v2944_v60 }
  0xac   :  { %2369 = vmatprep.subr.bf16.mxu1 %v2663_v0 }
  0xad   :  { %2443 = vmatpush3.bf16.msra.mxu0 %v2950_v3 }
  0xae   :  { %2444 = vmatprep.subr.bf16.mxu0 %v2663_v0 }
  0xaf   :  { %2371 = vmatpush3.bf16.msra.mxu1 %v2950_v3 }
  0xb0   :  { %2372 = vmatprep.subr.bf16.mxu1 %v2663_v0 }
  0xb1   :  { %2446 = vmatpush3.bf16.msra.mxu0 %v2964_v12 }
  0xb2   :  { %2447 = vmatprep.subr.bf16.mxu0 %v2663_v0 }
  0xb3   :  { %2374 = vmatpush3.bf16.msra.mxu1 %v2964_v12 }
  0xb4   :  { %2375 = vmatprep.subr.bf16.mxu1 %v2663_v0 }
 0x13e   :  { %v183_v23 = vpop.f32.mrb[0].mxu0 }
 0x13f   :  { %v1947_v29 = vpop.f32.mrb[1].mxu0 }
 0x141   :  { %v274_v30 = vpop.f32.mrb[0].mxu1 }
 0x142   :  { %v275_v31 = vadd.f32 %v274_v30, %v183_v23  ;;  %v1958_v37 = vpop.f32.mrb[1].mxu1 }
 0x146   :  { %v354_v43 = vpop.f32.mrb[2].mxu0 }
 0x147   :  { %v355_v44 = vadd.f32 %v354_v43, %v275_v31  ;;  %v1969_v45 = vpop.f32.mrb[3].mxu0 }
 0x149   :  { %v431_v49 = vpop.f32.mrb[2].mxu1 }
 0x14a   :  { %v432_v50 = vadd.f32 %v431_v49, %v355_v44  ;;  %v1980_v58 = vpop.f32.mrb[3].mxu1 }
 0x14e   :  { %v514_v59 = vpop.f32.mrb[4].mxu0 }
 0x14f   :  { %v515_v61 = vadd.f32 %v514_v59, %v432_v50  ;;  %v1991_v62 = vpop.f32.mrb[5].mxu0 }
 0x151   :  { %v589_v18 = vpop.f32.mrb[4].mxu1 }
 0x152   :  { %v590_v16 = vadd.f32 %v589_v18, %v515_v61  ;;  %v2002_v21 = vpop.f32.mrb[5].mxu1  ;;  %v1773_v18 = vld [vmem:[%s3173_s4] ss:$0 sm:$0xff] }
 0x156   :  { %v671_v15 = vpop.f32.mrb[6].mxu0 }
 0x157   :  { %v672_v7 = vadd.f32 %v671_v15, %v590_v16  ;;  %v2013_v22 = vpop.f32.mrb[7].mxu0 }
 0x159   :  { %v762_v6 = vpop.f32.mrb[6].mxu1 }
 0x15a   :  { %v763_v29 = vadd.f32 %v762_v6, %v672_v7  ;;  %v2024_v5 = vpop.f32.mrb[7].mxu1 }
 0x15e   :  { %v842_v23 = vpop.f32.mrb[8].mxu0 }
 0x15f   :  { %v843_v30 = vadd.f32 %v842_v23, %v763_v29  ;;  %v2035_v37 = vpop.f32.mrb[9].mxu0 }
 0x161   :  { %v919_v31 = vpop.f32.mrb[8].mxu1 }
 0x162   :  { %v920_v43 = vadd.f32 %v919_v31, %v843_v30  ;;  %v2046_v45 = vpop.f32.mrb[9].mxu1 }
 0x166   :  { %v1002_v44 = vpop.f32.mrb[10].mxu0 }
 0x167   :  { %v1003_v49 = vadd.f32 %v1002_v44, %v920_v43  ;;  %v2057_v58 = vpop.f32.mrb[11].mxu0 }
 0x169   :  { %v1077_v50 = vpop.f32.mrb[10].mxu1 }
 0x16a   :  { %v1078_v21 = vadd.f32 %v1077_v50, %v1003_v49  ;;  %v2068_v15 = vpop.f32.mrb[11].mxu1 }
 0x16c   :  { %v1088_v16 = vadd.f32 %v1773_v18, %v1078_v21 }
 0x16e   :  { %v1089_v22 = vmax.f32 %v1088_v16, 0.0 }
 0x170   :  { %v3057_v6 = vand.u32 4294901760, %v1089_v22 }
 0x172   :  { %v3060_v5 = vsub.f32 %v1089_v22, %v3057_v6 }
 0x174   :  { %v1196_v7 = vand.u32 4294901760, %v3060_v5 }
 0x176   :  { %2207 = vmatmul.mubr.f32.vlgmr.msra.gmra.mrb[12].mxu0 %v1196_v7  ;;  %v1197_v59 = vsub.f32 %v3060_v5, %v1196_v7 }
 0x177   :  { %2449 = vmatpush3.bf16.msra.mxu0 %v2975_v17  ;;  %2241 = vmatprep.mubr.msk.f32.mxu0 %vm2664_vm0, %v2665_v1  ;;  %v3177_v17 = vpack.c.bf16 %v2898_v27, %v2896_v26  ;;  %v3179_v26 = vpack.c.bf16 %v2918_v41, %v2916_v40  ;;  %v3181_v27 = vpack.c.bf16 %v2938_v55, %v2936_v54  ;;  %v1774_v41 = vld [vmem:[%s3175_s6] ss:$0 sm:$0xff] }
 0x178   :  { %2450 = vmatprep.subr.bf16.mxu0 %v2663_v0  ;;  %v1198_v61 = vand.u32 4294901760, %v1197_v59 }
 0x17a   :  { %2102 = vmatmul.mubr.f32.vlgmr.msra.gmra.mrb[12].mxu1 %v1198_v61 }
 0x17b   :  { %2377 = vmatpush3.bf16.msra.mxu1 %v2982_v24  ;;  %2452 = vmatpush3.bf16.msra.mxu0 %v2984_v28 }
 0x17c   :  { %2378 = vmatprep.subr.bf16.mxu1 %v2663_v0  ;;  %2453 = vmatprep.subr.bf16.mxu0 %v2663_v0 }
 0x17d   :  { %2136 = vmatprep.mubr.msk.f32.mxu1 %vm2664_vm0, %v2665_v1 }
 0x17f   :  { %2380 = vmatpush3.bf16.msra.mxu1 %v2990_v38  ;;  %2455 = vmatpush3.bf16.msra.mxu0 %v2992_v42 }
 0x180   :  { %2381 = vmatprep.subr.bf16.mxu1 %v2663_v0  ;;  %2456 = vmatprep.subr.bf16.mxu0 %v2663_v0 }
 0x183   :  { %2383 = vmatpush3.bf16.msra.mxu1 %v2998_v52  ;;  %2458 = vmatpush3.bf16.msra.mxu0 %v3000_v56 }
 0x184   :  { %2384 = vmatprep.subr.bf16.mxu1 %v2663_v0  ;;  %2459 = vmatprep.subr.bf16.mxu0 %v2663_v0 }
 0x187   :  { %2386 = vmatpush3.bf16.msra.mxu1 %v3006_v2  ;;  %2461 = vmatpush3.bf16.msra.mxu0 %v3008_v4 }
 0x188   :  { %2387 = vmatprep.subr.bf16.mxu1 %v2663_v0  ;;  %2462 = vmatprep.subr.bf16.mxu0 %v2663_v0 }
 0x18b   :  { %2389 = vmatpush3.bf16.msra.mxu1 %v3014_v19  ;;  %2464 = vmatpush3.bf16.msra.mxu0 %v3016_v20 }
 0x18c   :  { %2390 = vmatprep.subr.bf16.mxu1 %v2663_v0  ;;  %2465 = vmatprep.subr.bf16.mxu0 %v2663_v0 }
 0x18f   :  { %2392 = vmatpush3.bf16.msra.mxu1 %v3022_v35  ;;  %2467 = vmatpush3.bf16.msra.mxu0 %v3024_v36 }
 0x190   :  { %2393 = vmatprep.subr.bf16.mxu1 %v2663_v0  ;;  %2468 = vmatprep.subr.bf16.mxu0 %v2663_v0 }
 0x193   :  { %2395 = vmatpush3.bf16.msra.mxu1 %v3030_v51  ;;  %2470 = vmatpush3.bf16.msra.mxu0 %v3032_v57 }
 0x194   :  { %2396 = vmatprep.subr.bf16.mxu1 %v2663_v0  ;;  %2471 = vmatprep.subr.bf16.mxu0 %v2663_v0 }
 0x196   :  { %2242 = vmatmul.mubr.f32.vlgmr.msra.gmra.mrb[12].mxu0 %v3057_v6 }
 0x197   :  { %2398 = vmatpush3.bf16.msra.mxu1 %v3036_v63  ;;  %2473 = vmatpush3.bf16.msra.mxu0 %v2894_v25  ;;  %v3178_v25 = vpack.c.bf16 %v2908_v34, %v2906_v33  ;;  %v3183_v33 = vpack.c.bf16 %v2962_v11, %v2960_v10  ;;  %v3184_v34 = vpack.c.bf16 %v2968_v14, %v2966_v13 }
 0x198   :  { %2399 = vmatprep.subr.bf16.mxu1 %v2663_v0  ;;  %2474 = vmatprep.subr.bf16.mxu0 %v2663_v0 }
 0x199   :  { %2276 = vmatprep.mubr.msk.f32.mxu0 %vm2664_vm0, %v2665_v1 }
 0x19a   :  { %2137 = vmatmul.mubr.f32.vlgmr.msra.gmra.mrb[12].mxu1 %v3057_v6 }
 0x19b   :  { %2401 = vmatpush3.bf16.msra.mxu1 %v3177_v17  ;;  %2476 = vmatpush3.bf16.msra.mxu0 %v2904_v32  ;;  %v3182_v32 = vpack.c.bf16 %v2958_v9, %v2956_v8 }
 0x19c   :  { %2402 = vmatprep.subr.bf16.mxu1 %v2663_v0  ;;  %2477 = vmatprep.subr.bf16.mxu0 %v2663_v0 }
 0x19d   :  { %2171 = vmatprep.mubr.msk.f32.mxu1 %vm2664_vm0, %v2665_v1  ;;  %v3180_v1 = vpack.c.bf16 %v2928_v48, %v2926_v47 }
 0x19f   :  { %2404 = vmatpush3.bf16.msra.mxu1 %v3178_v25  ;;  %2479 = vmatpush3.bf16.msra.mxu0 %v2914_v39 }
 0x1a0   :  { %2405 = vmatprep.subr.bf16.mxu1 %v2663_v0  ;;  %2480 = vmatprep.subr.bf16.mxu0 %v2663_v0 }
 0x1a3   :  { %2407 = vmatpush3.bf16.msra.mxu1 %v3179_v26  ;;  %2482 = vmatpush3.bf16.msra.mxu0 %v2924_v46 }
 0x1a4   :  { %2408 = vmatprep.subr.bf16.mxu1 %v2663_v0  ;;  %2483 = vmatprep.subr.bf16.mxu0 %v2663_v0 }
 0x1a7   :  { %2410 = vmatpush3.bf16.msra.mxu1 %v3180_v1  ;;  %2485 = vmatpush3.bf16.msra.mxu0 %v2934_v53 }
 0x1a8   :  { %2411 = vmatprep.subr.bf16.mxu1 %v2663_v0  ;;  %2486 = vmatprep.subr.bf16.mxu0 %v2663_v0 }
 0x1ab   :  { %2413 = vmatpush3.bf16.msra.mxu1 %v3181_v27  ;;  %2488 = vmatpush3.bf16.msra.mxu0 %v2944_v60 }
 0x1ac   :  { %2414 = vmatprep.subr.bf16.mxu1 %v2663_v0  ;;  %2489 = vmatprep.subr.bf16.mxu0 %v2663_v0 }
 0x1af   :  { %2416 = vmatpush3.bf16.msra.mxu1 %v3182_v32  ;;  %2491 = vmatpush3.bf16.msra.mxu0 %v2950_v3 }
 0x1b0   :  { %2417 = vmatprep.subr.bf16.mxu1 %v2663_v0  ;;  %2492 = vmatprep.subr.bf16.mxu0 %v2663_v0 }
 0x1b3   :  { %2419 = vmatpush3.bf16.msra.mxu1 %v3183_v33  ;;  %2494 = vmatpush3.bf16.msra.mxu0 %v2964_v12 }
 0x1b4   :  { %2420 = vmatprep.subr.bf16.mxu1 %v2663_v0 }
 0x1b6   :  { %2277 = vmatmul.mubr.f32.vlgmr.msra.gmra.mrb[12].mxu0 %v3057_v6 }
 0x1b7   :  { %2422 = vmatpush3.bf16.msra.mxu1 %v3184_v34 }
 0x1ba   :  { %2172 = vmatmul.mubr.f32.vlgmr.msra.gmra.mrb[12].mxu1 %v3060_v5 }
 0x289   :  { %v1750_v39 = vpop.f32.mrb[12].mxu0 }
 0x28a   :  { %v2278_v40 = vpop.f32.mrb[13].mxu0 }
 0x28d   :  { %v1455_v46 = vpop.f32.mrb[12].mxu1 }
 0x28e   :  { %v2495_v47 = vadd.f32 %v1774_v41, %v1455_v46  ;;  %v2173_v48 = vpop.f32.mrb[13].mxu1 }
 0x290   :  { %v2496_v0 = vadd.f32 %v2495_v47, %v1750_v39 }
 0x292   :  { %1755 = vst.msk [vmem:[#allocation11] sm:$0xff] %vm1754_vm2, %v2496_v0 }
 0x293   :  { %2637 = shalt.err (!%p2634_p2)
}
 0x294   :  { %s2638_s6 = scalar_lea.hbm %s3176_s7, 128 }
 0x295   :  { %p2639_p3 = scmp.ne.s32.totalorder %s3176_s7, %s2638_s6  ;;  %p2642_p4 = scmp.lt.u32.totalorder %s2638_s6, %s3176_s7 }
 0x297   :  { %p2644_p5 = pnand %p2642_p4, %p2639_p3 }
 0x299   :  { %2647 = shalt.err (!%p2644_p5)
}
 0x29a   :  { %1765 = dma.vmem_to_hbm [thread:$0]  %s1763_s14, 128, %s3176_s7, [#allocation4]  }
 0x29b   :  { %2654 = dma.done.wait [#allocation4], 128  }
 0x29c   :  { %2655 = vsyncadd [#allocation4], 4294967168 }
 0x29d   :  { %1769 = vsyncpa [#allocation3], 1 }
 0x29e   :  { %1770 = vsyncpa [#allocation6], 1 }
 0x29f   :  { %1771 = vsyncpa [#allocation9], 1 }
 0x2a0   :  { %1772 = vsyncpa [#allocation4], 1 }

</bundles_post_ra>
